<compile_context>
chip_gen: v7x
topology: tpu7x:2x2x1
jax: 0.10.0
libtpu: 0.0.40
codegen_flags: <defaults>
</compile_context>

<pallas_src>
import jax
import jax.numpy as jnp
from jax import lax
from jax.experimental import pallas as pl
from jax.experimental.pallas import tpu as pltpu


def _round_up(x, m):
    return ((x + m - 1) // m) * m


def _make_kernel(t_chunk, b_pad, o_real):
    def kernel(x_ref, wih_ref, whh_ref, b_ref, wfc_ref, bfc_ref, out_ref,
               h_ref, xw_ref):
        # x_ref:   (t_chunk*B_pad, I)  bf16, time-major flattened chunk
        # wih_ref: (I, H_pad) bf16     whh_ref: (H_pad, H_pad) bf16
        # b_ref:   (1, H_pad) f32      wfc_ref: (H_pad, O_pad) bf16
        # bfc_ref: (1, O_pad) f32      out_ref: (B_pad, O_pad) f32
        # h_ref:   (B_pad, H_pad) f32 scratch (hidden-state carry across chunks)
        # xw_ref:  (t_chunk*B_pad, H_pad) f32 scratch (per-chunk projection)
        c = pl.program_id(0)

        @pl.when(c == 0)
        def _init():
            h_ref[...] = jnp.zeros_like(h_ref)

        # Hoisted per-chunk input projection: one batched bf16 MXU matmul off the
        # serial dependence chain, with the loop-invariant bias (b_ih + b_hh)
        # folded in once.  Written to VMEM scratch; the loop re-loads slices.
        xw_ref[...] = (
            jnp.dot(x_ref[...], wih_ref[...], preferred_element_type=jnp.float32)
            + b_ref[...])

        whh = whh_ref[...]  # (H_pad, H_pad) bf16 -> 8 vregs at 128x128

        def step(t, h):
            r = pl.multiple_of(t * b_pad, b_pad)
            pre = xw_ref[pl.ds(r, b_pad), :] + jnp.dot(
                h.astype(jnp.bfloat16), whh, preferred_element_type=jnp.float32)
            return jnp.tanh(pre)

        # Hidden state stays in vregs inside the chunk; VMEM only across chunks.
        h_ref[...] = lax.fori_loop(0, t_chunk, step, h_ref[...], unroll=True)

        @pl.when(c == pl.num_programs(0) - 1)
        def _finalize():
            h = h_ref[...]
            logits = (jnp.dot(h.astype(jnp.bfloat16), wfc_ref[...],
                              preferred_element_type=jnp.float32) + bfc_ref[...])
            # Mask padded output columns (finite sentinel, never written back
            # unmasked to real columns), then normalize exactly the way
            # torch.distributions.Categorical(logits=...) does.
            col = lax.broadcasted_iota(jnp.int32, logits.shape, 1)
            logits = jnp.where(col < o_real, logits, jnp.float32(-1e30))
            m = jnp.max(logits, axis=-1, keepdims=True)
            lse = m + jnp.log(jnp.sum(jnp.exp(logits - m), axis=-1, keepdims=True))
            out_ref[...] = (logits - lse).astype(out_ref.dtype)

    return kernel


def rnn_policy_forward(x_btf, w_ih, w_hh, b_ih, b_hh, w_fc, b_fc, t_chunk=None):
    """x_btf: (B, T, I) float32 (PyTorch batch_first convention).

    w_ih: (H, I), w_hh: (H, H), b_ih/b_hh: (H,)  -- nn.RNN parameter shapes
    w_fc: (O, H), b_fc: (O,)                     -- nn.Linear parameter shapes
    Returns normalized Categorical logits of shape (B, O), float32.
    """
    B, T, I = x_btf.shape
    H = w_hh.shape[0]
    O = w_fc.shape[0]

    B_pad = _round_up(B, 8)
    H_pad = _round_up(H, 128)
    O_pad = _round_up(O, 128)

    if t_chunk is None:
        t_chunk = next(d for d in range(min(T, 32), 0, -1) if T % d == 0)
    assert T % t_chunk == 0, "t_chunk must divide T"
    n_chunks = T // t_chunk

    f32, bf16 = jnp.float32, jnp.bfloat16

    # Time-major, batch-padded x flattened to (T*B_pad, I); transpose + pad fuse
    # into one HBM materialization, and I stays unpadded (full-extent block).
    # NOTE: padded BATCH rows evolve as tanh(bias)-driven state in the kernel --
    # harmless because they are sliced off below; never reduce over them.
    # Padded HIDDEN columns stay exactly 0 (zero weight columns, zero bias).
    x_tbf = jnp.transpose(x_btf, (1, 0, 2)).astype(bf16)                   # (T,B,I)
    x_flat = (jnp.zeros((T, B_pad, I), bf16).at[:, :B, :].set(x_tbf)
              .reshape(T * B_pad, I))

    wih_t = jnp.zeros((I, H_pad), bf16).at[:, :H].set(jnp.transpose(w_ih).astype(bf16))
    whh_t = jnp.zeros((H_pad, H_pad), bf16).at[:H, :H].set(jnp.transpose(w_hh).astype(bf16))
    wfc_t = jnp.zeros((H_pad, O_pad), bf16).at[:H, :O].set(jnp.transpose(w_fc).astype(bf16))
    b_rnn = jnp.zeros((1, H_pad), f32).at[:, :H].set((b_ih + b_hh).astype(f32).reshape(1, H))
    bfc_p = jnp.zeros((1, O_pad), f32).at[:, :O].set(b_fc.astype(f32).reshape(1, O))

    kernel = _make_kernel(t_chunk, B_pad, O)

    # VMEM budget: double-buffered x chunk + resident weights/biases/output +
    # scratch (h carry, per-chunk projection), with 2x headroom.
    resident = (
        2 * (t_chunk * B_pad * I * 2)                          # x chunk, 2 bufs
        + (I * H_pad + H_pad * H_pad + H_pad * O_pad) * 2      # bf16 weights
        + (H_pad + O_pad) * 4                                  # f32 biases
        + 2 * (B_pad * O_pad * 4)                              # output
        + (B_pad * H_pad + t_chunk * B_pad * H_pad) * 4)       # VMEM scratch
    vmem_limit = int(min(max(2 * resident + (1 << 20), 4 << 20), 100 << 20))

    grid_spec = pltpu.PrefetchScalarGridSpec(
        num_scalar_prefetch=0,
        grid=(n_chunks,),
        in_specs=[
            pl.BlockSpec((t_chunk * B_pad, I), lambda c: (c, 0)),   # streamed x
            pl.BlockSpec((I, H_pad), lambda c: (0, 0)),             # W_ih (resident)
            pl.BlockSpec((H_pad, H_pad), lambda c: (0, 0)),         # W_hh (resident)
            pl.BlockSpec((1, H_pad), lambda c: (0, 0)),             # b_ih+b_hh
            pl.BlockSpec((H_pad, O_pad), lambda c: (0, 0)),         # W_fc
            pl.BlockSpec((1, O_pad), lambda c: (0, 0)),             # b_fc
        ],
        out_specs=pl.BlockSpec((B_pad, O_pad), lambda c: (0, 0)),   # resident out
        scratch_shapes=[
            pltpu.VMEM((B_pad, H_pad), f32),                 # hidden-state carry
            pltpu.VMEM((t_chunk * B_pad, H_pad), f32),       # per-chunk projection
        ],
    )

    out_pad = pl.pallas_call(
        kernel,
        out_shape=jax.ShapeDtypeStruct((B_pad, O_pad), f32),
        grid_spec=grid_spec,
        compiler_params=pltpu.CompilerParams(
            dimension_semantics=("arbitrary",),   # serial recurrence over chunks
            vmem_limit_bytes=vmem_limit),
    )(x_flat, wih_t, whh_t, b_rnn, wfc_t, bfc_p)

    return out_pad[:B, :O]


def reference_forward(x_btf, w_ih, w_hh, b_ih, b_hh, w_fc, b_fc):
    """Pure-JAX f32 reference mirroring nn.RNN(batch_first=True) + Linear + Categorical.logits."""
    B, T, I = x_btf.shape
    H = w_hh.shape[0]
    h = jnp.zeros((B, H), jnp.float32)
    for t in range(T):
        h = jnp.tanh(x_btf[:, t, :] @ w_ih.T + h @ w_hh.T + b_ih + b_hh)
    logits = h @ w_fc.T + b_fc
    return logits - jax.scipy.special.logsumexp(logits, axis=-1, keepdims=True)


if __name__ == "__main__":
    # Small shapes consistent with the module.
    B, T, I, H, O = 2, 8, 4, 32, 6

    key = jax.random.PRNGKey(0)
    ks = jax.random.split(key, 7)
    bound_rnn = 1.0 / jnp.sqrt(H)
    bound_fc = 1.0 / jnp.sqrt(H)

    x = jax.random.normal(ks[0], (B, T, I), jnp.float32)
    w_ih = jax.random.uniform(ks[1], (H, I), jnp.float32, -bound_rnn, bound_rnn)
    w_hh = jax.random.uniform(ks[2], (H, H), jnp.float32, -bound_rnn, bound_rnn)
    b_ih = jax.random.uniform(ks[3], (H,), jnp.float32, -bound_rnn, bound_rnn)
    b_hh = jax.random.uniform(ks[4], (H,), jnp.float32, -bound_rnn, bound_rnn)
    w_fc = jax.random.uniform(ks[5], (O, H), jnp.float32, -bound_fc, bound_fc)
    b_fc = jax.random.uniform(ks[6], (O,), jnp.float32, -bound_fc, bound_fc)

    # t_chunk=4 -> 2-chunk grid: exercises the streamed-x path and the hidden
    # state carry across grid iterations.
    out = rnn_policy_forward(x, w_ih, w_hh, b_ih, b_hh, w_fc, b_fc, t_chunk=4)
    out = jax.block_until_ready(out)

    ref = reference_forward(x, w_ih, w_hh, b_ih, b_hh, w_fc, b_fc)
    assert out.shape == (B, O)
    # Tolerance loosened vs the f32 reference because MXU operands are bf16
    # (recurrent rounding accumulates over T); estimated drift here is ~1e-2.
    assert jnp.allclose(out, ref, atol=3e-2, rtol=3e-2), (out, ref)

    print("KERNEL_OK")
</pallas_src>

<mosaic_0001>
module attributes {stable_mosaic.version = 11 : i64} {
  func.func @kernel(%arg0: i32, %arg1: memref<32x4xbf16, #tpu.memory_space<vmem>>, %arg2: memref<4x128xbf16, #tpu.memory_space<vmem>>, %arg3: memref<128x128xbf16, #tpu.memory_space<vmem>>, %arg4: memref<1x128xf32, #tpu.memory_space<vmem>>, %arg5: memref<128x128xbf16, #tpu.memory_space<vmem>>, %arg6: memref<1x128xf32, #tpu.memory_space<vmem>>, %arg7: memref<8x128xf32, #tpu.memory_space<vmem>>, %arg8: memref<8x128xf32, #tpu.memory_space<vmem>>, %arg9: memref<32x128xf32, #tpu.memory_space<vmem>>) attributes {dimension_semantics = [#tpu.dimension_semantics<arbitrary>], iteration_bounds = array<i64: 2>, scalar_prefetch = 0 : i64, scratch_operands = 2 : i64, tpu.core_type = #tpu.core_type<tc>, window_params = [{transform_indices = @transform_0, window_bounds = array<i64: 32, 4>}, {pipeline_mode = #tpu.pipeline_mode<synchronous>, transform_indices = @transform_1, window_bounds = array<i64: 4, 128>}, {pipeline_mode = #tpu.pipeline_mode<synchronous>, transform_indices = @transform_2, window_bounds = array<i64: 128, 128>}, {pipeline_mode = #tpu.pipeline_mode<synchronous>, transform_indices = @transform_3, window_bounds = array<i64: 1, 128>}, {pipeline_mode = #tpu.pipeline_mode<synchronous>, transform_indices = @transform_4, window_bounds = array<i64: 128, 128>}, {pipeline_mode = #tpu.pipeline_mode<synchronous>, transform_indices = @transform_5, window_bounds = array<i64: 1, 128>}, {pipeline_mode = #tpu.pipeline_mode<synchronous>, transform_indices = @transform_6, window_bounds = array<i64: 8, 128>}]} {
    %c0_i32 = arith.constant 0 : i32
    %0 = arith.cmpi eq, %arg0, %c0_i32 : i32
    %1 = arith.extui %0 : i1 to i32
    %c0_i32_0 = arith.constant 0 : i32
    %2 = arith.cmpi ne, %1, %c0_i32_0 : i32
    scf.if %2 {
      %cst_28 = arith.constant 0.000000e+00 : f32
      %48 = vector.broadcast %cst_28 : f32 to vector<8x128xf32>
      %c0_29 = arith.constant 0 : index
      %c0_30 = arith.constant 0 : index
      %49 = vector.load %arg8[%c0_29, %c0_30] : memref<8x128xf32, #tpu.memory_space<vmem>>, vector<8x128xf32>
      tpu.vector_store %arg8[%c0_29, %c0_30], %48 {strides = array<i32>} : memref<8x128xf32, #tpu.memory_space<vmem>>, vector<8x128xf32>,
    } else {
    }
    %c0 = arith.constant 0 : index
    %c0_1 = arith.constant 0 : index
    %3 = vector.load %arg1[%c0, %c0_1] : memref<32x4xbf16, #tpu.memory_space<vmem>>, vector<32x4xbf16>
    %c0_2 = arith.constant 0 : index
    %c0_3 = arith.constant 0 : index
    %4 = vector.load %arg2[%c0_2, %c0_3] : memref<4x128xbf16, #tpu.memory_space<vmem>>, vector<4x128xbf16>
    %cst = arith.constant dense<0.000000e+00> : vector<32x128xf32>
    %5 = tpu.matmul %3, %4, %cst {dimension_numbers = #tpu.dot_dimension_numbers<[1], [0], [0], [1], [0, 0, 1, 1], [], []>} : vector<32x4xbf16>, vector<4x128xbf16>, vector<32x128xf32> -> vector<32x128xf32>
    %c0_4 = arith.constant 0 : index
    %c0_5 = arith.constant 0 : index
    %6 = vector.load %arg4[%c0_4, %c0_5] : memref<1x128xf32, #tpu.memory_space<vmem>>, vector<1x128xf32>
    %7 = vector.broadcast %6 : vector<1x128xf32> to vector<32x128xf32>
    %8 = arith.addf %5, %7 : vector<32x128xf32>
    %c0_6 = arith.constant 0 : index
    %c0_7 = arith.constant 0 : index
    %9 = vector.load %arg9[%c0_6, %c0_7] : memref<32x128xf32, #tpu.memory_space<vmem>>, vector<32x128xf32>
    tpu.vector_store %arg9[%c0_6, %c0_7], %8 {strides = array<i32>} : memref<32x128xf32, #tpu.memory_space<vmem>>, vector<32x128xf32>,
    %c0_8 = arith.constant 0 : index
    %c0_9 = arith.constant 0 : index
    %10 = vector.load %arg3[%c0_8, %c0_9] : memref<128x128xbf16, #tpu.memory_space<vmem>>, vector<128x128xbf16>
    %c0_10 = arith.constant 0 : index
    %c0_11 = arith.constant 0 : index
    %11 = vector.load %arg8[%c0_10, %c0_11] : memref<8x128xf32, #tpu.memory_space<vmem>>, vector<8x128xf32>
    %c0_i32_12 = arith.constant 0 : i32
    %c8_i32 = arith.constant 8 : i32
    %12 = arith.muli %c0_i32_12, %c8_i32 : i32
    %13 = tpu.assume_multiple %12, 8 : i32
    %14 = arith.index_cast %13 : i32 to index
    %c0_13 = arith.constant 0 : index
    %15 = vector.load %arg9[%14, %c0_13] : memref<32x128xf32, #tpu.memory_space<vmem>>, vector<8x128xf32>
    %16 = arith.truncf %11 : vector<8x128xf32> to vector<8x128xbf16>
    %cst_14 = arith.constant dense<0.000000e+00> : vector<8x128xf32>
    %17 = tpu.matmul %16, %10, %cst_14 {dimension_numbers = #tpu.dot_dimension_numbers<[1], [0], [0], [1], [0, 0, 1, 1], [], []>} : vector<8x128xbf16>, vector<128x128xbf16>, vector<8x128xf32> -> vector<8x128xf32>
    %18 = arith.addf %15, %17 : vector<8x128xf32>
    %19 = math.tanh %18 : vector<8x128xf32>
    %c1_i32 = arith.constant 1 : i32
    %c8_i32_15 = arith.constant 8 : i32
    %20 = arith.muli %c1_i32, %c8_i32_15 : i32
    %21 = tpu.assume_multiple %20, 8 : i32
    %22 = arith.index_cast %21 : i32 to index
    %c0_16 = arith.constant 0 : index
    %23 = vector.load %arg9[%22, %c0_16] : memref<32x128xf32, #tpu.memory_space<vmem>>, vector<8x128xf32>
    %24 = arith.truncf %19 : vector<8x128xf32> to vector<8x128xbf16>
    %cst_17 = arith.constant dense<0.000000e+00> : vector<8x128xf32>
    %25 = tpu.matmul %24, %10, %cst_17 {dimension_numbers = #tpu.dot_dimension_numbers<[1], [0], [0], [1], [0, 0, 1, 1], [], []>} : vector<8x128xbf16>, vector<128x128xbf16>, vector<8x128xf32> -> vector<8x128xf32>
    %26 = arith.addf %23, %25 : vector<8x128xf32>
    %27 = math.tanh %26 : vector<8x128xf32>
    %c2_i32 = arith.constant 2 : i32
    %c8_i32_18 = arith.constant 8 : i32
    %28 = arith.muli %c2_i32, %c8_i32_18 : i32
    %29 = tpu.assume_multiple %28, 8 : i32
    %30 = arith.index_cast %29 : i32 to index
    %c0_19 = arith.constant 0 : index
    %31 = vector.load %arg9[%30, %c0_19] : memref<32x128xf32, #tpu.memory_space<vmem>>, vector<8x128xf32>
    %32 = arith.truncf %27 : vector<8x128xf32> to vector<8x128xbf16>
    %cst_20 = arith.constant dense<0.000000e+00> : vector<8x128xf32>
    %33 = tpu.matmul %32, %10, %cst_20 {dimension_numbers = #tpu.dot_dimension_numbers<[1], [0], [0], [1], [0, 0, 1, 1], [], []>} : vector<8x128xbf16>, vector<128x128xbf16>, vector<8x128xf32> -> vector<8x128xf32>
    %34 = arith.addf %31, %33 : vector<8x128xf32>
    %35 = math.tanh %34 : vector<8x128xf32>
    %c3_i32 = arith.constant 3 : i32
    %c8_i32_21 = arith.constant 8 : i32
    %36 = arith.muli %c3_i32, %c8_i32_21 : i32
    %37 = tpu.assume_multiple %36, 8 : i32
    %38 = arith.index_cast %37 : i32 to index
    %c0_22 = arith.constant 0 : index
    %39 = vector.load %arg9[%38, %c0_22] : memref<32x128xf32, #tpu.memory_space<vmem>>, vector<8x128xf32>
    %40 = arith.truncf %35 : vector<8x128xf32> to vector<8x128xbf16>
    %cst_23 = arith.constant dense<0.000000e+00> : vector<8x128xf32>
    %41 = tpu.matmul %40, %10, %cst_23 {dimension_numbers = #tpu.dot_dimension_numbers<[1], [0], [0], [1], [0, 0, 1, 1], [], []>} : vector<8x128xbf16>, vector<128x128xbf16>, vector<8x128xf32> -> vector<8x128xf32>
    %42 = arith.addf %39, %41 : vector<8x128xf32>
    %43 = math.tanh %42 : vector<8x128xf32>
    %c4_i32 = arith.constant 4 : i32
    %c0_24 = arith.constant 0 : index
    %c0_25 = arith.constant 0 : index
    %44 = vector.load %arg8[%c0_24, %c0_25] : memref<8x128xf32, #tpu.memory_space<vmem>>, vector<8x128xf32>
    tpu.vector_store %arg8[%c0_24, %c0_25], %43 {strides = array<i32>} : memref<8x128xf32, #tpu.memory_space<vmem>>, vector<8x128xf32>,
    %c1_i32_26 = arith.constant 1 : i32
    %45 = arith.cmpi eq, %arg0, %c1_i32_26 : i32
    %46 = arith.extui %45 : i1 to i32
    %c0_i32_27 = arith.constant 0 : i32
    %47 = arith.cmpi ne, %46, %c0_i32_27 : i32
    scf.if %47 {
      %c0_28 = arith.constant 0 : index
      %c0_29 = arith.constant 0 : index
      %48 = vector.load %arg8[%c0_28, %c0_29] : memref<8x128xf32, #tpu.memory_space<vmem>>, vector<8x128xf32>
      %49 = arith.truncf %48 : vector<8x128xf32> to vector<8x128xbf16>
      %c0_30 = arith.constant 0 : index
      %c0_31 = arith.constant 0 : index
      %50 = vector.load %arg5[%c0_30, %c0_31] : memref<128x128xbf16, #tpu.memory_space<vmem>>, vector<128x128xbf16>
      %cst_32 = arith.constant dense<0.000000e+00> : vector<8x128xf32>
      %51 = tpu.matmul %49, %50, %cst_32 {dimension_numbers = #tpu.dot_dimension_numbers<[1], [0], [0], [1], [0, 0, 1, 1], [], []>} : vector<8x128xbf16>, vector<128x128xbf16>, vector<8x128xf32> -> vector<8x128xf32>
      %c0_33 = arith.constant 0 : index
      %c0_34 = arith.constant 0 : index
      %52 = vector.load %arg6[%c0_33, %c0_34] : memref<1x128xf32, #tpu.memory_space<vmem>>, vector<1x128xf32>
      %53 = vector.broadcast %52 : vector<1x128xf32> to vector<8x128xf32>
      %54 = arith.addf %51, %53 : vector<8x128xf32>
      %55 = tpu.iota {dimensions = array<i32: 1>} : vector<8x128xi32>
      %c6_i32 = arith.constant 6 : i32
      %56 = vector.broadcast %c6_i32 : i32 to vector<8x128xi32>
      %57 = arith.cmpi slt, %55, %56 : vector<8x128xi32>
      %cst_35 = arith.constant -1.000000e+30 : f32
      %58 = vector.broadcast %cst_35 : f32 to vector<8x128xf32>
      %59 = arith.select %57, %54, %58 : vector<8x128xi1>, vector<8x128xf32>
      %cst_36 = arith.constant dense<0xFF800000> : vector<8xf32>
      %60 = vector.multi_reduction <maximumf>, %59, %cst_36 [1] : vector<8x128xf32> to vector<8xf32>
      %61 = vector.shape_cast %60 : vector<8xf32> to vector<8x1xf32>
      %62 = vector.broadcast %61 : vector<8x1xf32> to vector<8x128xf32>
      %63 = arith.subf %59, %62 : vector<8x128xf32>
      %64 = math.exp %63 : vector<8x128xf32>
      %cst_37 = arith.constant dense<0.000000e+00> : vector<8xf32>
      %65 = vector.multi_reduction <add>, %64, %cst_37 [1] : vector<8x128xf32> to vector<8xf32>
      %66 = vector.shape_cast %65 : vector<8xf32> to vector<8x1xf32>
      %67 = math.log %66 : vector<8x1xf32>
      %68 = arith.addf %61, %67 : vector<8x1xf32>
      %69 = vector.broadcast %68 : vector<8x1xf32> to vector<8x128xf32>
      %70 = arith.subf %59, %69 : vector<8x128xf32>
      %c0_38 = arith.constant 0 : index
      %c0_39 = arith.constant 0 : index
      %71 = vector.load %arg7[%c0_38, %c0_39] : memref<8x128xf32, #tpu.memory_space<vmem>>, vector<8x128xf32>
      tpu.vector_store %arg7[%c0_38, %c0_39], %70 {strides = array<i32>} : memref<8x128xf32, #tpu.memory_space<vmem>>, vector<8x128xf32>,
    } else {
    }
    return
  }
  func.func @transform_0(%arg0: i32) -> (i32, i32) {
    %c0_i32 = arith.constant 0 : i32
    %c0_i32_0 = arith.constant 0 : i32
    return %arg0, %c0_i32 : i32, i32
  }
  func.func @transform_1(%arg0: i32) -> (i32, i32) {
    %c0_i32 = arith.constant 0 : i32
    %c0_i32_0 = arith.constant 0 : i32
    %c0_i32_1 = arith.constant 0 : i32
    return %c0_i32, %c0_i32_0 : i32, i32
  }
  func.func @transform_2(%arg0: i32) -> (i32, i32) {
    %c0_i32 = arith.constant 0 : i32
    %c0_i32_0 = arith.constant 0 : i32
    %c0_i32_1 = arith.constant 0 : i32
    return %c0_i32, %c0_i32_0 : i32, i32
  }
  func.func @transform_3(%arg0: i32) -> (i32, i32) {
    %c0_i32 = arith.constant 0 : i32
    %c0_i32_0 = arith.constant 0 : i32
    %c0_i32_1 = arith.constant 0 : i32
    return %c0_i32, %c0_i32_0 : i32, i32
  }
  func.func @transform_4(%arg0: i32) -> (i32, i32) {
    %c0_i32 = arith.constant 0 : i32
    %c0_i32_0 = arith.constant 0 : i32
    %c0_i32_1 = arith.constant 0 : i32
    return %c0_i32, %c0_i32_0 : i32, i32
  }
  func.func @transform_5(%arg0: i32) -> (i32, i32) {
    %c0_i32 = arith.constant 0 : i32
    %c0_i32_0 = arith.constant 0 : i32
    %c0_i32_1 = arith.constant 0 : i32
    return %c0_i32, %c0_i32_0 : i32, i32
  }
  func.func @transform_6(%arg0: i32) -> (i32, i32) {
    %c0_i32 = arith.constant 0 : i32
    %c0_i32_0 = arith.constant 0 : i32
    %c0_i32_1 = arith.constant 0 : i32
    return %c0_i32, %c0_i32_0 : i32, i32
  }
}

</mosaic_0001>

<bundles_post_ra>
// kernel: tpu_custom_call.1
= control target key start
LH: loop header
LB: loop body
LE: loop exit
PB: predicated region body
PF: predicated region fallthrough
CT: control target
= control target key end

     0   :  { %11 = vsyncpa [#allocation5], 0  ;;  %s1434_s0 = inlined_call_operand.vmem [shape: bf16[64,4], index: 0, kind: input, shape index: {}]   ;;  %s1435_s1 = inlined_call_operand.vmem [shape: bf16[4,128], index: 1, kind: input, shape index: {}]   ;;  %s1436_s2 = inlined_call_operand.hbm [shape: bf16[128,128], index: 2, kind: input, shape index: {}]   ;;  %s1437_s3 = inlined_call_operand.vmem [shape: f32[1,128], index: 3, kind: input, shape index: {}]   ;;  %s1438_s4 = inlined_call_operand.hbm [shape: bf16[128,128], index: 4, kind: input, shape index: {}]   ;;  %s1439_s5 = inlined_call_operand.vmem [shape: f32[1,128], index: 5, kind: input, shape index: {}]   ;;  %s1440_s6 = inlined_call_operand.hbm [shape: f32[8,128], index: 6, kind: output, shape index: {}]  }
   0x1   :  { %12 = vsyncpa [#allocation8], 0 }
   0x2   :  { %13 = vsyncpa [#allocation6], 0  ;;  %s1221_s21 = smov 0  }
   0x3 LB: > { %s1227_s22 = sadd.s32 4294967295, %s1174_s21   ;;  %p809_p0 = scmp.ge.s32.totalorder %s1174_s21, 1  ;;  %s1174_s21 = sphi %s1221_s21, %s19_s21  }
   0x4   : > { %p176_p1 = scmp.lt.s32.totalorder %s1174_s21, 3  ;;  %s1176_s23 = smov [#allocation4]  }
   0x5   : > { %s191_s24 = sshll.u32 %s1176_s23, 4  ;;  %p1441_p4 = scmp.eq.s32.totalorder %s1227_s22, 0  ;;  %s192_s24 = int_to_ptr.vmem [resolvable:$true] %s191_s24 }
   0x6   : > { %p1232_p3 = pnand %p809_p0, %p176_p1  ;;  %s1177_s26 = smov [#allocation7]  }
   0x7   : > { %s207_s27 = sshll.u32 %s1177_s26, 4  ;;  %s1074_s7 = scalar_lea.hbm %s1436_s2, 1024  ;;  %s1245_s27 = int_to_ptr.vmem [resolvable:$true] %s207_s27 }
   0x8   : > { %s1443_s25 = scalar_select %p1232_p3, 1, 0 }
   0x9   : > { %p1013_p5 = pneg %p1232_p3  ;;  %p1075_p7 = scmp.ne.s32.totalorder %s1436_s2, %s1074_s7 }
   0xa   : > { %p1081_p11 = scmp.lt.u32.totalorder %s1074_s7, %s1436_s2 }
   0xb   : > { %p1241_p6 = pnand %p1441_p4, %p1013_p5 }
   0xd   : > { %p1076_p8 = pneg %p1241_p6 }
   0xf   : > { %p1077_p9 = pnand %p1076_p8, %p1075_p7 }
  0x11   : > { %p1078_p10 = pneg %p1077_p9 }
  0x13   : > { %p1083_p12 = pnand %p1081_p11, %p1078_p10 }
  0x15   : > { %1086 = shalt.err (!%p1083_p12)
}
  0x16   : > { %s1087_s12 = scalar_lea.vmem %s192_s24, 1024  ;;  %p1095_p5 = scmp.lt.s32.totalorder %s192_s24, %s192_s24 }
  0x17   : > { %p1088_p13 = scmp.ne.s32.totalorder %s192_s24, %s1087_s12  ;;  %p1096_p2 = scmp.lt.s32.totalorder %s1087_s12, %s1087_s12 }
  0x19   : > { %p1090_p0 = pnand %p1088_p13, %p1076_p8  ;;  %p1097_p4 = por %p1096_p2, %p1095_p5 }
  0x1b   : > { %p1091_p1 = pneg %p1090_p0 }
  0x1d   : > { %p1098_p3 = pnand %p1097_p4, %p1091_p1 }
  0x1f   : > { %1101 = shalt.err (!%p1098_p3)
}
  0x20   : > { %s1178_s13 = smov 64   ;;  %s1179_s14 = smov 4  }
  0x21   : > { %1016 = dma.hbm_to_vmem [thread:$0]  (!%p1241_p6), %s1436_s2, 1024, %s192_s24, [#allocation5], %s1178_s13, %s1178_s13, %s1179_s14  }
  0x22   : > { %s1102_s19 = scalar_lea.hbm %s1438_s4, 1024 }
  0x23   : > { %p1103_p7 = scmp.ne.s32.totalorder %s1438_s4, %s1102_s19  ;;  %p1109_p4 = scmp.lt.u32.totalorder %s1102_s19, %s1438_s4 }
  0x25   : > { %p1105_p2 = pnand %p1103_p7, %p1076_p8 }
  0x27   : > { %p1106_p3 = pneg %p1105_p2 }
  0x29   : > { %p1111_p9 = pnand %p1109_p4, %p1106_p3 }
  0x2b   : > { %1114 = shalt.err (!%p1111_p9)
}
  0x2c   : > { %s1115_s24 = scalar_lea.vmem %s1245_s27, 1024  ;;  %p1123_p13 = scmp.lt.s32.totalorder %s1245_s27, %s1245_s27 }
  0x2d   : > { %p1116_p10 = scmp.ne.s32.totalorder %s1245_s27, %s1115_s24  ;;  %p1124_p0 = scmp.lt.s32.totalorder %s1115_s24, %s1115_s24 }
  0x2f   : > { %p1118_p11 = pnand %p1116_p10, %p1076_p8  ;;  %p1125_p1 = por %p1124_p0, %p1123_p13 }
  0x31   : > { %p1119_p12 = pneg %p1118_p11 }
  0x33   : > { %p1126_p5 = pnand %p1125_p1, %p1119_p12 }
  0x35   : > { %1129 = shalt.err (!%p1126_p5)
}
  0x36   : > { %1019 = dma.hbm_to_vmem [thread:$0]  (!%p1241_p6), %s1438_s4, 1024, %s1245_s27, [#allocation8], %s1178_s13, %s1178_s13, %s1179_s14  }
  0x37   : > { %p1445_p7 = scmp.ne.s32.totalorder %s1443_s25, 0 }
  0x38   : > { %p1446_p2 = scmp.eq.s32.totalorder (!%p1445_p7), %s1227_s22, 0 }
  0x39   : > { %235 = sbr.rel (%p1445_p7) target bundleno = 1583 (0x62f), region = 44 }
  0x40   : > { %1161 = dma.done.wait (%p1446_p2), [#allocation5], 1024   ;;  %p1447_p8 = pmov %p1446_p2 }
  0x41   : > { %p1448_p3 = pmov %p1446_p2 }
  0x42   : > { %1163 = vsyncadd (%p1447_p8), [#allocation5], 4294966272 }
  0x43   : > { %1165 = dma.done.wait (%p1448_p3), [#allocation8], 1024   ;;  %p1449_p4 = pmov %p1446_p2 }
  0x44   : > { %s816_s28 = sshll.u32 %s1227_s22, 2  ;;  %p1450_p6 = scmp.ne.s32.totalorder %s1227_s22, 0 }
  0x45   : > { %1167 = vsyncadd (%p1449_p4), [#allocation8], 4294966272  ;;  %p265_p9 = scmp.lt.s32.totalorder %s816_s28, 7  ;;  %v1180_v0 = vmov (!%p1450_p6), 0.0  }
  0x46   : > { %274 = sbr.rel (%p1450_p6) target bundleno = 77 (0x4d), region = 56  ;;  %275 = vst [vmem:[#allocation2] sm:$0xff] (!%p1450_p6), %v1180_v0 }
  0x47   : > { %s1452_s28 = smov (!%p265_p9, %s816_s28), 7 }
  0x48   : > { %s817_s27 = sshll.u32 %s1452_s28, 2 }
  0x49   : > { %s268_s9 = scalar_lea.vmem %s1434_s0, %s817_s27 }
  0x4d PF: > { %v1310_v1 = vld [vmem:[#allocation4] sm:$0xff]   ;;  %v1181_v2 = vmov 0.0   ;;  %v1314_v3 = vld [vmem:[#allocation4 + $0x8] sm:$0xff]   ;;  %vm305_vm0 = vcmask 1041408   ;;  %vm1182_vm1 = vmmov 0   ;;  %v1319_v4 = vld [vmem:[#allocation4 + $0x10] sm:$0xff]  }
  0x4e   : > { %900 = vmatprep.subr.bf16.mxu1 %v1181_v2  ;;  %916 = vmatprep.mubr.msk.bf16.mxu1 %vm1182_vm1, %v1181_v2  ;;  %vm298_vm2 = vcmask 31744   ;;  %v280_v5 = vld [vmem:[%s1435_s1] sm:$0x3]  ;;  %v1052_v8 = vld [vmem:[%s268_s9 + $0x8] sm:$0xff]   ;;  %v1342_v11 = vld [vmem:[#allocation4 + $0x28] sm:$0xff]   ;;  %p832_p10 = scmp.ne.s32.totalorder %s1227_s22, 1 }
  0x4f   : > { %901 = vmatpush3.bf16.msra.mxu1 %v1310_v1  ;;  %1000 = vmatprep.subr.msk.bf16.mxu0 %vm305_vm0, %v280_v5  ;;  %v307_v6 = vsel %vm305_vm0, %v280_v5, 0  ;;  %v1050_v7 = vld [vmem:[%s268_s9] sm:$0xff]   ;;  %v1336_v10 = vld [vmem:[#allocation4 + $0x20] sm:$0xff]   ;;  %v1348_v12 = vld [vmem:[#allocation4 + $0x30] sm:$0xff]   ;;  %v1183_v53 = vmov (!%p832_p10), 0.0   ;;  %vm1184_vm3 = vmmov (!%p832_p10), 0   ;;  %v724_v63 = vlaneseq (!%p832_p10) }
  0x50   : > { %902 = vmatprep.subr.bf16.mxu1 %v1181_v2  ;;  %895 = vmatpush3.bf16.msra.mxu0 %v307_v6  ;;  %v1328_v9 = vld [vmem:[#allocation4 + $0x18] sm:$0xff]   ;;  %v1062_v52 = vld [vmem:[#allocation7] sm:$0xff] (!%p832_p10)   ;;  %v1063_v54 = vld [vmem:[#allocation7 + $0x8] sm:$0xff] (!%p832_p10)  }
  0x51   : > { %896 = vmatprep.mubr.msk.bf16.mxu0 %vm298_vm2, %v1050_v7  ;;  %920 = vmatprep.subr.bf16.mxu0 %v1181_v2  ;;  %v1354_v13 = vld [vmem:[#allocation4 + $0x38] sm:$0xff]   ;;  %v1064_v55 = vld [vmem:[#allocation7 + $0x10] sm:$0xff] (!%p832_p10)   ;;  %v1066_v57 = vld [vmem:[#allocation7 + $0x20] sm:$0xff] (!%p832_p10)   ;;  %v725_v0 = vand.u32 (!%p832_p10), 127, %v724_v63 }
  0x52   : > { %v378_v14 = vld [vmem:[#allocation2] sm:$0xff]  ;;  %v1067_v58 = vld [vmem:[#allocation7 + $0x28] sm:$0xff] (!%p832_p10)   ;;  %v1068_v59 = vld [vmem:[#allocation7 + $0x30] sm:$0xff] (!%p832_p10)  }
  0x53   : > { %903 = vmatpush3.bf16.msra.mxu1 %v1314_v3  ;;  %897 = vmatmul.mubr.msk.bf16.vlgmr.msra.gmra.mrb[0].mxu0 %vm298_vm2, %v1052_v8  ;;  %v380_v15 = vpack.c.bf16 %v378_v14, %v378_v14  ;;  %v819_v16 = vld [vmem:[%s1437_s3] ss:$0 sm:$0xff]  ;;  %vm726_vm4 = vcmp.lt.s32.totalorder (!%p832_p10), %v725_v0, 6 }
  0x54   : > { %904 = vmatprep.subr.bf16.mxu1 %v1181_v2  ;;  %921 = vmatpush3.bf16.msra.mxu0 %v1310_v1  ;;  %v1065_v56 = vld [vmem:[#allocation7 + $0x18] sm:$0xff] (!%p832_p10)  }
  0x55   : > { %936 = vmatprep.mubr.msk.bf16.mxu0 %vm1182_vm1, %v1181_v2  ;;  %922 = vmatprep.subr.bf16.mxu0 %v1181_v2  ;;  %v1069_v60 = vld [vmem:[#allocation7 + $0x38] sm:$0xff] (!%p832_p10)  }
  0x57   : > { %905 = vmatpush3.bf16.msra.mxu1 %v1319_v4 }
  0x58   : > { %906 = vmatprep.subr.bf16.mxu1 %v1181_v2  ;;  %923 = vmatpush3.bf16.msra.mxu0 %v1314_v3 }
  0x59   : > { %924 = vmatprep.subr.bf16.mxu0 %v1181_v2 }
  0x5b   : > { %907 = vmatpush3.bf16.msra.mxu1 %v1328_v9 }
  0x5c   : > { %908 = vmatprep.subr.bf16.mxu1 %v1181_v2  ;;  %925 = vmatpush3.bf16.msra.mxu0 %v1319_v4 }
  0x5d   : > { %926 = vmatprep.subr.bf16.mxu0 %v1181_v2 }
  0x5f   : > { %909 = vmatpush3.bf16.msra.mxu1 %v1336_v10 }
  0x60   : > { %910 = vmatprep.subr.bf16.mxu1 %v1181_v2  ;;  %927 = vmatpush3.bf16.msra.mxu0 %v1328_v9 }
  0x61   : > { %928 = vmatprep.subr.bf16.mxu0 %v1181_v2 }
  0x63   : > { %911 = vmatpush3.bf16.msra.mxu1 %v1342_v11 }
  0x64   : > { %912 = vmatprep.subr.bf16.mxu1 %v1181_v2  ;;  %929 = vmatpush3.bf16.msra.mxu0 %v1336_v10 }
  0x65   : > { %930 = vmatprep.subr.bf16.mxu0 %v1181_v2 }
  0x67   : > { %913 = vmatpush3.bf16.msra.mxu1 %v1348_v12 }
  0x68   : > { %914 = vmatprep.subr.bf16.mxu1 %v1181_v2  ;;  %931 = vmatpush3.bf16.msra.mxu0 %v1342_v11 }
  0x69   : > { %932 = vmatprep.subr.bf16.mxu0 %v1181_v2 }
  0x6b   : > { %915 = vmatpush3.bf16.msra.mxu1 %v1354_v13 }
  0x6c   : > { %940 = vmatprep.subr.bf16.mxu1 %v1181_v2  ;;  %933 = vmatpush3.bf16.msra.mxu0 %v1348_v12 }
  0x6d   : > { %934 = vmatprep.subr.bf16.mxu0 %v1181_v2 }
  0x6e   : > { %917 = vmatmul.mubr.bf16.vlgmr.msra.gmra.mrb[0].mxu1 %v380_v15 }
  0x6f   : > { %941 = vmatpush3.bf16.msra.mxu1 %v1310_v1  ;;  %956 = vmatprep.mubr.msk.bf16.mxu1 %vm1182_vm1, %v1181_v2 }
  0x70   : > { %942 = vmatprep.subr.bf16.mxu1 %v1181_v2  ;;  %935 = vmatpush3.bf16.msra.mxu0 %v1354_v13 }
  0x71   : > { %960 = vmatprep.subr.bf16.mxu0 %v1181_v2 }
  0x73   : > { %943 = vmatpush3.bf16.msra.mxu1 %v1314_v3 }
  0x74   : > { %944 = vmatprep.subr.bf16.mxu1 %v1181_v2 }
  0x77   : > { %945 = vmatpush3.bf16.msra.mxu1 %v1319_v4 }
  0x78   : > { %946 = vmatprep.subr.bf16.mxu1 %v1181_v2 }
  0x7b   : > { %947 = vmatpush3.bf16.msra.mxu1 %v1328_v9 }
  0x7c   : > { %948 = vmatprep.subr.bf16.mxu1 %v1181_v2 }
  0x7f   : > { %949 = vmatpush3.bf16.msra.mxu1 %v1336_v10 }
  0x80   : > { %950 = vmatprep.subr.bf16.mxu1 %v1181_v2 }
  0x83   : > { %951 = vmatpush3.bf16.msra.mxu1 %v1342_v11 }
  0x84   : > { %952 = vmatprep.subr.bf16.mxu1 %v1181_v2 }
  0x87   : > { %953 = vmatpush3.bf16.msra.mxu1 %v1348_v12 }
  0x88   : > { %954 = vmatprep.subr.bf16.mxu1 %v1181_v2 }
  0x8b   : > { %955 = vmatpush3.bf16.msra.mxu1 %v1354_v13 }
 0x126   : > { %v898_v17 = vpop.f32.mrb[0].mxu0 }
 0x127   : > { %v352_v18 = vadd.f32 %v898_v17, %v819_v16  ;;  %v343_v19 = vpop.f32.mrb[1].mxu0 }
 0x128   : > { %v899_v20 = vpop.f32.mrb[2].mxu0  ;;  %v344_v24 = vadd.f32 %v819_v16, %v343_v19 }
 0x129   : > { %v355_v21 = vadd.f32 %v899_v20, %v819_v16  ;;  %v346_v22 = vpop.f32.mrb[3].mxu0 }
 0x12a   : > { %v347_v23 = vadd.f32 %v819_v16, %v346_v22 }
 0x141   : > { %v463_v25 = vpop.f32.mrb[0].mxu1 }
 0x142   : > { %v469_v26 = vadd.f32 %v463_v25, %v344_v24  ;;  %v918_v27 = vpop.f32.mrb[1].mxu1 }
 0x143   : > { %v466_v28 = vpop.f32.mrb[2].mxu1 }
 0x144   : > { %1054 = vtanh.f32 %v469_v26  ;;  %v919_v29 = vpop.f32.mrb[3].mxu1 }
 0x14e   : > { %v1055_v30 = vpop.eup %1054 }
 0x14f   : > { %v473_v31 = vpack.c.bf16 %v1055_v30, %v1055_v30 }
 0x151   : > { %937 = vmatmul.mubr.bf16.vlgmr.msra.gmra.mrb[4].mxu0 %v473_v31 }
 0x152   : > { %961 = vmatpush3.bf16.msra.mxu0 %v1310_v1  ;;  %976 = vmatprep.mubr.msk.bf16.mxu0 %vm1182_vm1, %v1181_v2  ;;  %v833_v1 = vld [vmem:[%s1439_s5] ss:$0 sm:$0xff] (!%p832_p10) }
 0x153   : > { %962 = vmatprep.subr.bf16.mxu0 %v1181_v2 }
 0x156   : > { %963 = vmatpush3.bf16.msra.mxu0 %v1314_v3 }
 0x157   : > { %964 = vmatprep.subr.bf16.mxu0 %v1181_v2 }
 0x15a   : > { %965 = vmatpush3.bf16.msra.mxu0 %v1319_v4 }
 0x15b   : > { %966 = vmatprep.subr.bf16.mxu0 %v1181_v2 }
 0x15e   : > { %967 = vmatpush3.bf16.msra.mxu0 %v1328_v9 }
 0x15f   : > { %968 = vmatprep.subr.bf16.mxu0 %v1181_v2 }
 0x162   : > { %969 = vmatpush3.bf16.msra.mxu0 %v1336_v10 }
 0x163   : > { %970 = vmatprep.subr.bf16.mxu0 %v1181_v2 }
 0x166   : > { %971 = vmatpush3.bf16.msra.mxu0 %v1342_v11 }
 0x167   : > { %972 = vmatprep.subr.bf16.mxu0 %v1181_v2 }
 0x16a   : > { %973 = vmatpush3.bf16.msra.mxu0 %v1348_v12 }
 0x16b   : > { %974 = vmatprep.subr.bf16.mxu0 %v1181_v2 }
 0x16e   : > { %975 = vmatpush3.bf16.msra.mxu0 %v1354_v13 }
 0x16f   : > { %980 = vmatprep.subr.bf16.mxu0 (!%p832_p10), %v1183_v53 }
 0x224   : > { %v508_v32 = vpop.f32.mrb[4].mxu0 }
 0x225   : > { %v514_v33 = vadd.f32 %v508_v32, %v347_v23  ;;  %v938_v34 = vpop.f32.mrb[5].mxu0 }
 0x226   : > { %v511_v35 = vpop.f32.mrb[6].mxu0 }
 0x227   : > { %1056 = vtanh.f32 %v514_v33  ;;  %v939_v36 = vpop.f32.mrb[7].mxu0 }
 0x231   : > { %v1057_v37 = vpop.eup %1056 }
 0x232   : > { %v518_v38 = vpack.c.bf16 %v1057_v37, %v1057_v37 }
 0x234   : > { %957 = vmatmul.mubr.bf16.vlgmr.msra.gmra.mrb[4].mxu1 %v518_v38 }
 0x307   : > { %v553_v39 = vpop.f32.mrb[4].mxu1 }
 0x308   : > { %v559_v40 = vadd.f32 %v553_v39, %v352_v18  ;;  %v958_v41 = vpop.f32.mrb[5].mxu1 }
 0x309   : > { %v556_v42 = vpop.f32.mrb[6].mxu1 }
 0x30a   : > { %1058 = vtanh.f32 %v559_v40  ;;  %v959_v43 = vpop.f32.mrb[7].mxu1 }
 0x314   : > { %v1059_v44 = vpop.eup %1058 }
 0x315   : > { %v563_v45 = vpack.c.bf16 %v1059_v44, %v1059_v44 }
 0x317   : > { %977 = vmatmul.mubr.bf16.vlgmr.msra.gmra.mrb[8].mxu0 %v563_v45 }
 0x318   : > { %981 = vmatpush3.bf16.msra.mxu0 (!%p832_p10), %v1062_v52  ;;  %996 = vmatprep.mubr.msk.bf16.mxu0 (!%p832_p10), %vm1184_vm3, %v1183_v53 }
 0x319   : > { %982 = vmatprep.subr.bf16.mxu0 (!%p832_p10), %v1183_v53 }
 0x31c   : > { %983 = vmatpush3.bf16.msra.mxu0 (!%p832_p10), %v1063_v54 }
 0x31d   : > { %984 = vmatprep.subr.bf16.mxu0 (!%p832_p10), %v1183_v53 }
 0x320   : > { %985 = vmatpush3.bf16.msra.mxu0 (!%p832_p10), %v1064_v55 }
 0x321   : > { %986 = vmatprep.subr.bf16.mxu0 (!%p832_p10), %v1183_v53 }
 0x324   : > { %987 = vmatpush3.bf16.msra.mxu0 (!%p832_p10), %v1065_v56 }
 0x325   : > { %988 = vmatprep.subr.bf16.mxu0 (!%p832_p10), %v1183_v53 }
 0x328   : > { %989 = vmatpush3.bf16.msra.mxu0 (!%p832_p10), %v1066_v57 }
 0x329   : > { %990 = vmatprep.subr.bf16.mxu0 (!%p832_p10), %v1183_v53 }
 0x32c   : > { %991 = vmatpush3.bf16.msra.mxu0 (!%p832_p10), %v1067_v58 }
 0x32d   : > { %992 = vmatprep.subr.bf16.mxu0 (!%p832_p10), %v1183_v53 }
 0x330   : > { %993 = vmatpush3.bf16.msra.mxu0 (!%p832_p10), %v1068_v59 }
 0x331   : > { %994 = vmatprep.subr.bf16.mxu0 (!%p832_p10), %v1183_v53 }
 0x334   : > { %995 = vmatpush3.bf16.msra.mxu0 (!%p832_p10), %v1069_v60 }
 0x3ea   : > { %v598_v46 = vpop.f32.mrb[8].mxu0 }
 0x3eb   : > { %v604_v47 = vadd.f32 %v598_v46, %v355_v21  ;;  %v978_v48 = vpop.f32.mrb[9].mxu0 }
 0x3ec   : > { %v601_v49 = vpop.f32.mrb[10].mxu0 }
 0x3ed   : > { %1060 = vtanh.f32 %v604_v47  ;;  %v979_v50 = vpop.f32.mrb[11].mxu0 }
 0x3f2   : > { %610 = sbr.rel (%p832_p10) target bundleno = 1558 (0x616), region = 60 }
 0x3f7   : > { %v1061_v51 = vpop.eup %1060 }
 0x3f8   : > { %606 = vst [vmem:[#allocation2] sm:$0xff] %v1061_v51 }
 0x3ff   : > { %v611_v61 = vld [vmem:[#allocation2] sm:$0xff] }
 0x400   : > { %v612_v62 = vpack.c.bf16 %v611_v61, %v611_v61 }
 0x402   : > { %997 = vmatmul.mubr.bf16.vlgmr.msra.gmra.mrb[0].mxu0 %v612_v62 }
 0x4d5   : > { %v718_v2 = vpop.f32.mrb[0].mxu0 }
 0x4d6   : > { %v719_v3 = vadd.f32 %v833_v1, %v718_v2  ;;  %v998_v4 = vpop.f32.mrb[1].mxu0 }
 0x4d7   : > { %v721_v5 = vpop.f32.mrb[2].mxu0 }
 0x4d8   : > { %v999_v6 = vpop.f32.mrb[3].mxu0  ;;  %v727_v7 = vsel %vm726_vm4, %v719_v3, -1e+30 }
 0x4d9   : > { %728 = vmax.xlane.f32.xlu0 %v727_v7 }
 0x566   : > { %v729_v8 = vpop.xlane.xlu0 %728 }
 0x567   : > { %v730_v9 = vsub.f32 %v727_v7, %v729_v8 }
 0x569   : > { %v731_v10 = vmul.f32 1.442695, %v730_v9 }
 0x56b   : > { %1070 = vpow2.f32 %v731_v10 }
 0x575   : > { %v1071_v11 = vpop.eup %1070 }
 0x576   : > { %733 = vadd.xlane.f32.xlu0 %v1071_v11 }
 0x603   : > { %v734_v12 = vpop.xlane.xlu0 %733 }
 0x604   : > { %1072 = vlog2.f32 %v734_v12 }
 0x60e   : > { %v1073_v13 = vpop.eup %1072 }
 0x60f   : > { %v736_v14 = vmul.f32 0.6931472, %v1073_v13 }
 0x611   : > { %v737_v15 = vadd.f32 %v736_v14, %v729_v8 }
 0x613   : > { %v738_v16 = vsub.f32 %v727_v7, %v737_v15 }
 0x615   : > { %739 = vst [vmem:[#allocation9] sm:$0xff] %v738_v16 }
 0x616 PF: > { %p1024_p11 = scmp.eq.s32.totalorder %s1227_s22, 1  ;;  %s1185_s16 = smov [#allocation9]  }
 0x617   : > { %s747_s17 = sshll.u32 %s1185_s16, 4  ;;  %s748_s17 = int_to_ptr.vmem [resolvable:$true] %s747_s17 }
 0x618   : > { %s1130_s18 = scalar_lea.vmem %s748_s17, 128  ;;  %p1137_p1 = scmp.lt.s32.totalorder %s748_s17, %s748_s17 }
 0x619   : > { %p1131_p12 = scmp.ne.s32.totalorder %s748_s17, %s1130_s18  ;;  %p1138_p5 = scmp.lt.s32.totalorder %s1130_s18, %s1130_s18 }
 0x61b   : > { %p1132_p13 = pnand %p1131_p12, %p1024_p11  ;;  %p1139_p7 = por %p1138_p5, %p1137_p1 }
 0x61d   : > { %p1133_p0 = pneg %p1132_p13 }
 0x61f   : > { %p1140_p2 = pnand %p1139_p7, %p1133_p0 }
 0x621   : > { %1143 = shalt.err (!%p1140_p2)
}
 0x622   : > { %s1144_s23 = scalar_lea.hbm %s1440_s6, 128 }
 0x623   : > { %p1145_p8 = scmp.ne.s32.totalorder %s1440_s6, %s1144_s23  ;;  %p1150_p9 = scmp.lt.u32.totalorder %s1144_s23, %s1440_s6 }
 0x625   : > { %p1146_p3 = pnand %p1145_p8, %p1024_p11 }
 0x627   : > { %p1147_p4 = pneg %p1146_p3 }
 0x629   : > { %p1152_p6 = pnand %p1150_p9, %p1147_p4 }
 0x62b   : > { %1155 = shalt.err (!%p1152_p6)
}
 0x62c   : > { %1010 = dma.vmem_to_hbm [thread:$0]  (%p1024_p11), %s748_s17, 128, %s1440_s6, [#allocation6]  }
 0x62d   : > { %1169 = dma.done.wait (%p1024_p11), [#allocation6], 128  }
 0x62e   : > { %1171 = vsyncadd (%p1024_p11), [#allocation6], 4294967168 }
 0x62f PF: > { %s19_s21 = sadd.s32 1, %s1174_s21  }
 0x630   : > { %p16_p10 = scmp.ge.s32.totalorder %s19_s21, 4  }
 0x632   :  { %18 = sbr.rel (!%p16_p10) target bundleno = 3 (0x3), region = 91 }
 0x639   :  { %760 = vsyncpa [#allocation5], 1 }
 0x63a   :  { %762 = vsyncpa [#allocation5 + $0x1], 1 }
 0x63b   :  { %763 = vsyncpa [#allocation8], 1 }
 0x63c   :  { %764 = vsyncpa [#allocation6], 1 }
 0x63d   :  { %766 = vsyncpa [#allocation6 + $0x1], 1 }

</bundles_post_ra>
